<compile_context>
chip_gen: v6e
topology: v6e:2x2x1
jax: 0.10.0
libtpu: 0.0.40
codegen_flags: <defaults>
</compile_context>

<pallas_src>
import jax
import jax.numpy as jnp
from jax.experimental import pallas as pl
from jax.experimental.pallas import tpu as pltpu


def census_net_kernel(
    x_ref,
    w1_ref, b1_ref,
    w2_ref, b2_ref,
    w3_ref, b3_ref,
    w4_ref, b4_ref,
    w5_ref, b5_ref,
    w6_ref, b6_ref,
    o_ref,
):
    # Parameter loads hoisted once; these tiles are grid-resident (constant
    # index_map) and tiny, keeping the vector-load slots free for x.
    w1, b1 = w1_ref[...], b1_ref[...]
    w2, b2 = w2_ref[...], b2_ref[...]
    w3, b3 = w3_ref[...], b3_ref[...]
    w4, b4 = w4_ref[...], b4_ref[...]
    w5, b5 = w5_ref[...], b5_ref[...]
    w6, b6 = w6_ref[...], b6_ref[...]

    def layer(h_bf16, w, b, relu):
        # (N_out, N_in) bf16 @ (N_in, tb) bf16 -> (N_out, tb) f32 on the MXU.
        z = jnp.dot(w, h_bf16, preferred_element_type=jnp.float32) + b
        if relu:
            z = jnp.maximum(z, 0.0)
        return z

    h = x_ref[...]                                  # (feat, tb) bf16
    h = layer(h, w1, b1, True).astype(jnp.bfloat16)  # (64, tb)
    h = layer(h, w2, b2, True).astype(jnp.bfloat16)  # (32, tb)
    h = layer(h, w3, b3, True).astype(jnp.bfloat16)  # (16, tb)
    h = layer(h, w4, b4, True).astype(jnp.bfloat16)  # (8,  tb)
    h = layer(h, w5, b5, True).astype(jnp.bfloat16)  # (4,  tb)
    z = layer(h, w6, b6, False)                      # (2,  tb) f32, no ReLU
    o_ref[...] = z.astype(o_ref.dtype)               # lane-dense store


def _round_up(n, m):
    return ((n + m - 1) // m) * m


def init_params(num_of_features, key):
    """Deterministic synthetic parameters matching nn.Linear shapes.

    PyTorch nn.Linear(in, out): weight (out, in), bias (out,).  We keep the
    weight in (out, in) layout (feature-major kernel) and store the bias as
    (out, 1) so it broadcasts over the lane (batch) axis.
    """
    dims = [num_of_features, 64, 32, 16, 8, 4, 2]
    params = []
    for i in range(6):
        key, kw, kb = jax.random.split(key, 3)
        fan_in, fan_out = dims[i], dims[i + 1]
        bound = 1.0 / jnp.sqrt(jnp.float32(fan_in))
        w = jax.random.uniform(kw, (fan_out, fan_in), jnp.float32, -bound, bound)
        b = jax.random.uniform(kb, (fan_out, 1), jnp.float32, -bound, bound)
        params.append((w, b))
    return params


def census_net_forward(x, params, *, block_batch=4096):
    # torch.flatten(x, 1)
    x = x.reshape(x.shape[0], -1)
    batch, feat = x.shape

    # Batch lives on the 128-lane axis in the kernel -> tile must be a
    # multiple of 128.
    tb = _round_up(min(block_batch, _round_up(batch, 128)), 128)
    # Guarantee >= 2 grid steps when batch allows, so "parallel" sharding
    # keeps both v7x TensorCores busy.
    if batch > 128 and _round_up(batch, tb) // tb < 2:
        tb = _round_up(pl.cdiv(batch, 2), 128)
    padded = _round_up(batch, tb)

    # Stream x feature-major in bf16; f32 accumulation happens in the kernel.
    xt = x.astype(jnp.bfloat16).T                    # (feat, batch)
    if padded != batch:
        xt = jnp.pad(xt, ((0, 0), (0, padded - batch)))

    grid = (padded // tb,)

    flat_params = []
    in_specs = [pl.BlockSpec((feat, tb), lambda i: (0, i))]   # streamed x tile
    for (w, b) in params:
        flat_params.append(jnp.asarray(w, jnp.bfloat16))
        flat_params.append(jnp.asarray(b, jnp.float32))
        # Constant block index => parameter buffers stay resident in VMEM.
        in_specs.append(pl.BlockSpec(tuple(w.shape), lambda i: (0, 0)))
        in_specs.append(pl.BlockSpec(tuple(b.shape), lambda i: (0, 0)))

    out_spec = pl.BlockSpec((2, tb), lambda i: (0, i))        # lane-dense

    flops = 2 * padded * sum(int(w.shape[0]) * int(w.shape[1]) for w, _ in params)
    param_bytes = sum(int(w.size) * 2 + int(b.size) * 4 for w, b in params)
    bytes_accessed = padded * feat * 2 + padded * 2 * 4 + param_bytes

    out = pl.pallas_call(
        census_net_kernel,
        out_shape=jax.ShapeDtypeStruct((2, padded), jnp.float32),
        grid=grid,
        in_specs=in_specs,
        out_specs=out_spec,
        compiler_params=pltpu.CompilerParams(
            dimension_semantics=("parallel",),
            vmem_limit_bytes=32 * 1024 * 1024),
        cost_estimate=pl.CostEstimate(
            flops=flops, transcendentals=0, bytes_accessed=bytes_accessed),
    )(xt, *flat_params)

    # (2, padded) -> (batch, 2); the tiny transpose is a cheap XLA op.
    return out[:, :batch].T


def reference_forward(x, params):
    # Mirrors the kernel's bf16-weight / bf16-activation, f32-accumulate math.
    h = x.reshape(x.shape[0], -1).astype(jnp.bfloat16).astype(jnp.float32)
    for i, (w, b) in enumerate(params):
        wf = w.astype(jnp.bfloat16).astype(jnp.float32)      # (out, in)
        z = jnp.dot(h, wf.T, precision=jax.lax.Precision.HIGHEST) + b.reshape(1, -1)
        if i < 5:
            z = jnp.maximum(z, 0.0)
            h = z.astype(jnp.bfloat16).astype(jnp.float32)
        else:
            h = z
    return h


if __name__ == "__main__":
    num_of_features = 16
    batch = 256          # small, but large enough to exercise a 2-step grid

    key = jax.random.PRNGKey(0)
    key, kx = jax.random.split(key)
    x = jax.random.normal(kx, (batch, num_of_features), jnp.float32)
    params = init_params(num_of_features, key)

    out = census_net_forward(x, params)      # tb=128, grid=(2,)
    out = jax.block_until_ready(out)

    ref = reference_forward(x, params)
    assert out.shape == (batch, 2), out.shape
    assert jnp.allclose(out, ref, atol=1e-3, rtol=1e-3), (out, ref)

    print("KERNEL_OK")
</pallas_src>

<mosaic_0001>
module attributes {stable_mosaic.version = 11 : i64} {
  func.func @census_net_kernel(%arg0: i32, %arg1: memref<16x128xbf16, #tpu.memory_space<vmem>>, %arg2: memref<64x16xbf16, #tpu.memory_space<vmem>>, %arg3: memref<64x1xf32, #tpu.memory_space<vmem>>, %arg4: memref<32x64xbf16, #tpu.memory_space<vmem>>, %arg5: memref<32x1xf32, #tpu.memory_space<vmem>>, %arg6: memref<16x32xbf16, #tpu.memory_space<vmem>>, %arg7: memref<16x1xf32, #tpu.memory_space<vmem>>, %arg8: memref<8x16xbf16, #tpu.memory_space<vmem>>, %arg9: memref<8x1xf32, #tpu.memory_space<vmem>>, %arg10: memref<4x8xbf16, #tpu.memory_space<vmem>>, %arg11: memref<4x1xf32, #tpu.memory_space<vmem>>, %arg12: memref<2x4xbf16, #tpu.memory_space<vmem>>, %arg13: memref<2x1xf32, #tpu.memory_space<vmem>>, %arg14: memref<2x128xf32, #tpu.memory_space<vmem>>) attributes {dimension_semantics = [#tpu.dimension_semantics<parallel>], iteration_bounds = array<i64: 2>, scalar_prefetch = 0 : i64, scratch_operands = 0 : i64, tpu.core_type = #tpu.core_type<tc>, window_params = [{transform_indices = @transform_0, window_bounds = array<i64: 16, 128>}, {pipeline_mode = #tpu.pipeline_mode<synchronous>, transform_indices = @transform_1, window_bounds = array<i64: 64, 16>}, {pipeline_mode = #tpu.pipeline_mode<synchronous>, transform_indices = @transform_2, window_bounds = array<i64: 64, 1>}, {pipeline_mode = #tpu.pipeline_mode<synchronous>, transform_indices = @transform_3, window_bounds = array<i64: 32, 64>}, {pipeline_mode = #tpu.pipeline_mode<synchronous>, transform_indices = @transform_4, window_bounds = array<i64: 32, 1>}, {pipeline_mode = #tpu.pipeline_mode<synchronous>, transform_indices = @transform_5, window_bounds = array<i64: 16, 32>}, {pipeline_mode = #tpu.pipeline_mode<synchronous>, transform_indices = @transform_6, window_bounds = array<i64: 16, 1>}, {pipeline_mode = #tpu.pipeline_mode<synchronous>, transform_indices = @transform_7, window_bounds = array<i64: 8, 16>}, {pipeline_mode = #tpu.pipeline_mode<synchronous>, transform_indices = @transform_8, window_bounds = array<i64: 8, 1>}, {pipeline_mode = #tpu.pipeline_mode<synchronous>, transform_indices = @transform_9, window_bounds = array<i64: 4, 8>}, {pipeline_mode = #tpu.pipeline_mode<synchronous>, transform_indices = @transform_10, window_bounds = array<i64: 4, 1>}, {pipeline_mode = #tpu.pipeline_mode<synchronous>, transform_indices = @transform_11, window_bounds = array<i64: 2, 4>}, {pipeline_mode = #tpu.pipeline_mode<synchronous>, transform_indices = @transform_12, window_bounds = array<i64: 2, 1>}, {transform_indices = @transform_13, window_bounds = array<i64: 2, 128>}]} {
    %c0 = arith.constant 0 : index
    %c0_0 = arith.constant 0 : index
    %0 = vector.load %arg2[%c0, %c0_0] : memref<64x16xbf16, #tpu.memory_space<vmem>>, vector<64x16xbf16>
    %c0_1 = arith.constant 0 : index
    %c0_2 = arith.constant 0 : index
    %1 = vector.load %arg3[%c0_1, %c0_2] : memref<64x1xf32, #tpu.memory_space<vmem>>, vector<64x1xf32>
    %c0_3 = arith.constant 0 : index
    %c0_4 = arith.constant 0 : index
    %2 = vector.load %arg4[%c0_3, %c0_4] : memref<32x64xbf16, #tpu.memory_space<vmem>>, vector<32x64xbf16>
    %c0_5 = arith.constant 0 : index
    %c0_6 = arith.constant 0 : index
    %3 = vector.load %arg5[%c0_5, %c0_6] : memref<32x1xf32, #tpu.memory_space<vmem>>, vector<32x1xf32>
    %c0_7 = arith.constant 0 : index
    %c0_8 = arith.constant 0 : index
    %4 = vector.load %arg6[%c0_7, %c0_8] : memref<16x32xbf16, #tpu.memory_space<vmem>>, vector<16x32xbf16>
    %c0_9 = arith.constant 0 : index
    %c0_10 = arith.constant 0 : index
    %5 = vector.load %arg7[%c0_9, %c0_10] : memref<16x1xf32, #tpu.memory_space<vmem>>, vector<16x1xf32>
    %c0_11 = arith.constant 0 : index
    %c0_12 = arith.constant 0 : index
    %6 = vector.load %arg8[%c0_11, %c0_12] : memref<8x16xbf16, #tpu.memory_space<vmem>>, vector<8x16xbf16>
    %c0_13 = arith.constant 0 : index
    %c0_14 = arith.constant 0 : index
    %7 = vector.load %arg9[%c0_13, %c0_14] : memref<8x1xf32, #tpu.memory_space<vmem>>, vector<8x1xf32>
    %c0_15 = arith.constant 0 : index
    %c0_16 = arith.constant 0 : index
    %8 = vector.load %arg10[%c0_15, %c0_16] : memref<4x8xbf16, #tpu.memory_space<vmem>>, vector<4x8xbf16>
    %c0_17 = arith.constant 0 : index
    %c0_18 = arith.constant 0 : index
    %9 = vector.load %arg11[%c0_17, %c0_18] : memref<4x1xf32, #tpu.memory_space<vmem>>, vector<4x1xf32>
    %c0_19 = arith.constant 0 : index
    %c0_20 = arith.constant 0 : index
    %10 = vector.load %arg12[%c0_19, %c0_20] : memref<2x4xbf16, #tpu.memory_space<vmem>>, vector<2x4xbf16>
    %c0_21 = arith.constant 0 : index
    %c0_22 = arith.constant 0 : index
    %11 = vector.load %arg13[%c0_21, %c0_22] : memref<2x1xf32, #tpu.memory_space<vmem>>, vector<2x1xf32>
    %c0_23 = arith.constant 0 : index
    %c0_24 = arith.constant 0 : index
    %12 = vector.load %arg1[%c0_23, %c0_24] : memref<16x128xbf16, #tpu.memory_space<vmem>>, vector<16x128xbf16>
    %cst = arith.constant dense<0.000000e+00> : vector<64x128xf32>
    %13 = tpu.matmul %0, %12, %cst {dimension_numbers = #tpu.dot_dimension_numbers<[1], [0], [0], [1], [0, 0, 1, 1], [], []>} : vector<64x16xbf16>, vector<16x128xbf16>, vector<64x128xf32> -> vector<64x128xf32>
    %14 = vector.broadcast %1 : vector<64x1xf32> to vector<64x128xf32>
    %15 = arith.addf %13, %14 : vector<64x128xf32>
    %cst_25 = arith.constant 0.000000e+00 : f32
    %16 = vector.broadcast %cst_25 : f32 to vector<64x128xf32>
    %17 = arith.maximumf %15, %16 : vector<64x128xf32>
    %18 = arith.truncf %17 : vector<64x128xf32> to vector<64x128xbf16>
    %cst_26 = arith.constant dense<0.000000e+00> : vector<32x128xf32>
    %19 = tpu.matmul %2, %18, %cst_26 {dimension_numbers = #tpu.dot_dimension_numbers<[1], [0], [0], [1], [0, 0, 1, 1], [], []>} : vector<32x64xbf16>, vector<64x128xbf16>, vector<32x128xf32> -> vector<32x128xf32>
    %20 = vector.broadcast %3 : vector<32x1xf32> to vector<32x128xf32>
    %21 = arith.addf %19, %20 : vector<32x128xf32>
    %cst_27 = arith.constant 0.000000e+00 : f32
    %22 = vector.broadcast %cst_27 : f32 to vector<32x128xf32>
    %23 = arith.maximumf %21, %22 : vector<32x128xf32>
    %24 = arith.truncf %23 : vector<32x128xf32> to vector<32x128xbf16>
    %cst_28 = arith.constant dense<0.000000e+00> : vector<16x128xf32>
    %25 = tpu.matmul %4, %24, %cst_28 {dimension_numbers = #tpu.dot_dimension_numbers<[1], [0], [0], [1], [0, 0, 1, 1], [], []>} : vector<16x32xbf16>, vector<32x128xbf16>, vector<16x128xf32> -> vector<16x128xf32>
    %26 = vector.broadcast %5 : vector<16x1xf32> to vector<16x128xf32>
    %27 = arith.addf %25, %26 : vector<16x128xf32>
    %cst_29 = arith.constant 0.000000e+00 : f32
    %28 = vector.broadcast %cst_29 : f32 to vector<16x128xf32>
    %29 = arith.maximumf %27, %28 : vector<16x128xf32>
    %30 = arith.truncf %29 : vector<16x128xf32> to vector<16x128xbf16>
    %cst_30 = arith.constant dense<0.000000e+00> : vector<8x128xf32>
    %31 = tpu.matmul %6, %30, %cst_30 {dimension_numbers = #tpu.dot_dimension_numbers<[1], [0], [0], [1], [0, 0, 1, 1], [], []>} : vector<8x16xbf16>, vector<16x128xbf16>, vector<8x128xf32> -> vector<8x128xf32>
    %32 = vector.broadcast %7 : vector<8x1xf32> to vector<8x128xf32>
    %33 = arith.addf %31, %32 : vector<8x128xf32>
    %cst_31 = arith.constant 0.000000e+00 : f32
    %34 = vector.broadcast %cst_31 : f32 to vector<8x128xf32>
    %35 = arith.maximumf %33, %34 : vector<8x128xf32>
    %36 = arith.truncf %35 : vector<8x128xf32> to vector<8x128xbf16>
    %cst_32 = arith.constant dense<0.000000e+00> : vector<4x128xf32>
    %37 = tpu.matmul %8, %36, %cst_32 {dimension_numbers = #tpu.dot_dimension_numbers<[1], [0], [0], [1], [0, 0, 1, 1], [], []>} : vector<4x8xbf16>, vector<8x128xbf16>, vector<4x128xf32> -> vector<4x128xf32>
    %38 = vector.broadcast %9 : vector<4x1xf32> to vector<4x128xf32>
    %39 = arith.addf %37, %38 : vector<4x128xf32>
    %cst_33 = arith.constant 0.000000e+00 : f32
    %40 = vector.broadcast %cst_33 : f32 to vector<4x128xf32>
    %41 = arith.maximumf %39, %40 : vector<4x128xf32>
    %42 = arith.truncf %41 : vector<4x128xf32> to vector<4x128xbf16>
    %cst_34 = arith.constant dense<0.000000e+00> : vector<2x128xf32>
    %43 = tpu.matmul %10, %42, %cst_34 {dimension_numbers = #tpu.dot_dimension_numbers<[1], [0], [0], [1], [0, 0, 1, 1], [], []>} : vector<2x4xbf16>, vector<4x128xbf16>, vector<2x128xf32> -> vector<2x128xf32>
    %44 = vector.broadcast %11 : vector<2x1xf32> to vector<2x128xf32>
    %45 = arith.addf %43, %44 : vector<2x128xf32>
    %c0_35 = arith.constant 0 : index
    %c0_36 = arith.constant 0 : index
    %46 = vector.load %arg14[%c0_35, %c0_36] : memref<2x128xf32, #tpu.memory_space<vmem>>, vector<2x128xf32>
    tpu.vector_store %arg14[%c0_35, %c0_36], %45 {strides = array<i32>} : memref<2x128xf32, #tpu.memory_space<vmem>>, vector<2x128xf32>,
    return
  }
  func.func @transform_0(%arg0: i32) -> (i32, i32) {
    %c0_i32 = arith.constant 0 : i32
    %c0_i32_0 = arith.constant 0 : i32
    return %c0_i32, %arg0 : i32, i32
  }
  func.func @transform_1(%arg0: i32) -> (i32, i32) {
    %c0_i32 = arith.constant 0 : i32
    %c0_i32_0 = arith.constant 0 : i32
    %c0_i32_1 = arith.constant 0 : i32
    return %c0_i32, %c0_i32_0 : i32, i32
  }
  func.func @transform_2(%arg0: i32) -> (i32, i32) {
    %c0_i32 = arith.constant 0 : i32
    %c0_i32_0 = arith.constant 0 : i32
    %c0_i32_1 = arith.constant 0 : i32
    return %c0_i32, %c0_i32_0 : i32, i32
  }
  func.func @transform_3(%arg0: i32) -> (i32, i32) {
    %c0_i32 = arith.constant 0 : i32
    %c0_i32_0 = arith.constant 0 : i32
    %c0_i32_1 = arith.constant 0 : i32
    return %c0_i32, %c0_i32_0 : i32, i32
  }
  func.func @transform_4(%arg0: i32) -> (i32, i32) {
    %c0_i32 = arith.constant 0 : i32
    %c0_i32_0 = arith.constant 0 : i32
    %c0_i32_1 = arith.constant 0 : i32
    return %c0_i32, %c0_i32_0 : i32, i32
  }
  func.func @transform_5(%arg0: i32) -> (i32, i32) {
    %c0_i32 = arith.constant 0 : i32
    %c0_i32_0 = arith.constant 0 : i32
    %c0_i32_1 = arith.constant 0 : i32
    return %c0_i32, %c0_i32_0 : i32, i32
  }
  func.func @transform_6(%arg0: i32) -> (i32, i32) {
    %c0_i32 = arith.constant 0 : i32
    %c0_i32_0 = arith.constant 0 : i32
    %c0_i32_1 = arith.constant 0 : i32
    return %c0_i32, %c0_i32_0 : i32, i32
  }
  func.func @transform_7(%arg0: i32) -> (i32, i32) {
    %c0_i32 = arith.constant 0 : i32
    %c0_i32_0 = arith.constant 0 : i32
    %c0_i32_1 = arith.constant 0 : i32
    return %c0_i32, %c0_i32_0 : i32, i32
  }
  func.func @transform_8(%arg0: i32) -> (i32, i32) {
    %c0_i32 = arith.constant 0 : i32
    %c0_i32_0 = arith.constant 0 : i32
    %c0_i32_1 = arith.constant 0 : i32
    return %c0_i32, %c0_i32_0 : i32, i32
  }
  func.func @transform_9(%arg0: i32) -> (i32, i32) {
    %c0_i32 = arith.constant 0 : i32
    %c0_i32_0 = arith.constant 0 : i32
    %c0_i32_1 = arith.constant 0 : i32
    return %c0_i32, %c0_i32_0 : i32, i32
  }
  func.func @transform_10(%arg0: i32) -> (i32, i32) {
    %c0_i32 = arith.constant 0 : i32
    %c0_i32_0 = arith.constant 0 : i32
    %c0_i32_1 = arith.constant 0 : i32
    return %c0_i32, %c0_i32_0 : i32, i32
  }
  func.func @transform_11(%arg0: i32) -> (i32, i32) {
    %c0_i32 = arith.constant 0 : i32
    %c0_i32_0 = arith.constant 0 : i32
    %c0_i32_1 = arith.constant 0 : i32
    return %c0_i32, %c0_i32_0 : i32, i32
  }
  func.func @transform_12(%arg0: i32) -> (i32, i32) {
    %c0_i32 = arith.constant 0 : i32
    %c0_i32_0 = arith.constant 0 : i32
    %c0_i32_1 = arith.constant 0 : i32
    return %c0_i32, %c0_i32_0 : i32, i32
  }
  func.func @transform_13(%arg0: i32) -> (i32, i32) {
    %c0_i32 = arith.constant 0 : i32
    %c0_i32_0 = arith.constant 0 : i32
    return %c0_i32, %arg0 : i32, i32
  }
}

</mosaic_0001>

<bundles_post_ra>
// kernel: tpu_custom_call.1
= control target key start
LH: loop header
LB: loop body
LE: loop exit
PB: predicated region body
PF: predicated region fallthrough
CT: control target
= control target key end

     0   :  { %s1559_s0 = inlined_call_operand.vmem [shape: bf16[16,256], index: 0, kind: input, shape index: {}]   ;;  %s1560_s1 = inlined_call_operand.vmem [shape: bf16[64,16], index: 1, kind: input, shape index: {}]   ;;  %s1561_s2 = inlined_call_operand.vmem [shape: f32[64,1], index: 2, kind: input, shape index: {}]   ;;  %s1562_s3 = inlined_call_operand.vmem [shape: bf16[32,64], index: 3, kind: input, shape index: {}]   ;;  %s1563_s4 = inlined_call_operand.vmem [shape: f32[32,1], index: 4, kind: input, shape index: {}]   ;;  %s1564_s5 = inlined_call_operand.vmem [shape: bf16[16,32], index: 5, kind: input, shape index: {}]   ;;  %s1565_s6 = inlined_call_operand.vmem [shape: f32[16,1], index: 6, kind: input, shape index: {}]   ;;  %s1566_s7 = inlined_call_operand.vmem [shape: bf16[8,16], index: 7, kind: input, shape index: {}]   ;;  %s1567_s8 = inlined_call_operand.vmem [shape: f32[8,1], index: 8, kind: input, shape index: {}]   ;;  %s1568_s9 = inlined_call_operand.vmem [shape: bf16[4,8], index: 9, kind: input, shape index: {}]   ;;  %s1569_s10 = inlined_call_operand.vmem [shape: f32[4,1], index: 10, kind: input, shape index: {}]   ;;  %s1570_s11 = inlined_call_operand.vmem [shape: bf16[2,4], index: 11, kind: input, shape index: {}]   ;;  %s1571_s12 = inlined_call_operand.vmem [shape: f32[2,1], index: 12, kind: input, shape index: {}]   ;;  %s1572_s13 = inlined_call_operand.hbm [shape: f32[2,256], index: 13, kind: output, shape index: {}]  }
   0x1   :  { %1574 = sst [smem:[#allocation7_spill]] %s1559_s0 }
   0x2   :  { %1575 = sst [smem:[#allocation8_spill]] %s1560_s1 }
   0x3   :  { %18 = vsyncpa [#allocation4], 0 }
   0x4   :  { %20 = vsyncpa [#allocation4 + $0x1], 0  ;;  %s1358_s25 = smov 0   ;;  %s1360_s26 = smov 0  }
   0x5   :  { %s1362_s27 = smov 0   ;;  %s1364_s28 = smov 0  }
   0x6 LB: > { %s1573_s29 = sadd.s32 4294967295, %s1282_s28   ;;  %s1072_s30 = sadd.s32 4294967294, %s1282_s28   ;;  %s1282_s28 = sphi %s1364_s28, %s1586_s28   ;;  %s1278_s27 = sphi %s1362_s27, %s1585_s27   ;;  %s1274_s26 = sphi %s1360_s26, %s1584_s26   ;;  %s1270_s25 = sphi %s1358_s25, %s1583_s25  }
   0x7   : > { %s1381_s14 = sadd.s32 1, %s1282_s28   ;;  %s33_s15 = sadd.s32 1, %s1278_s27 }
   0x8   : > { %s30_s16 = ssub.s32 %s1282_s28, %s1381_s14  ;;  %p40_p0 = scmp.ne.s32.totalorder %s1278_s27, %s1274_s26 }
   0x9   : > { %p31_p1 = scmp.eq.s32.totalorder %s30_s16, 0  ;;  %p41_p2 = scmp.eq.s32.totalorder %s1282_s28, 0 }
   0xa   : > { %p322_p3 = scmp.eq.s32.totalorder %s1573_s29, 1  ;;  %p327_p4 = scmp.ne.s32.totalorder %s1274_s26, %s1270_s25 }
   0xb   : > { %s1394_s17 = scalar_select %p31_p1, %s1278_s27, %s33_s15  }
   0xc   : > { %p42_p5 = por %p41_p2, %p40_p0  ;;  %p1396_p6 = por %p322_p3, %p40_p0 }
   0xd   : > { %1576 = sst [smem:[#allocation6_spill]] %s1394_s17  ;;  %p328_p7 = scmp.eq.s32.totalorder %s1072_s30, 1 }
   0xe   : > { %p1074_p9 = scmp.ge.s32.totalorder %s1282_s28, 2 }
   0xf   : > { %p1400_p8 = por %p328_p7, %p327_p4 }
  0x10   : > { %380 = sbr.rel (%p1074_p9) target bundleno = 32 (0x20), region = 64 }
  0x15   : > { %383 = sbr.rel (!%p42_p5) target bundleno = 32 (0x20), region = 68  ;;  %s385_s20 = sand.u32 (%p42_p5), 1, %s1278_s27  }
  0x16   : > { %s1076_s21 = sshll.u32 (%p42_p5), %s1282_s28, 2  ;;  %s1075_s22 = sshll.u32 (%p42_p5), %s385_s20, 3 }
  0x17   : > { %s1579_s0 = sld [smem:[#allocation7_spill]] (%p42_p5)  ;;  %s387_s30 = scalar_lea.vmem (%p42_p5), [#allocation2], %s1075_s22 }
  0x1d   : > { %s389_s15 = scalar_lea.vmem %s1579_s0, %s1076_s21 }
  0x1e   : > { %v406_v0 = vld [vmem:[%s389_s15] sm:$0xf]  ;;  %v408_v1 = vld [vmem:[%s389_s15 + $0x8] sm:$0xf] }
  0x1f   : > { %407 = vst [vmem:[%s387_s30] sm:$0xf] %v406_v0  ;;  %409 = vst [vmem:[%s387_s30 + $0x4] sm:$0xf] %v408_v1 }
  0x20 PF: > { %p1077_p10 = scmp.ge.s32.totalorder %s1282_s28, 1  ;;  %p436_p11 = scmp.lt.s32.totalorder %s1282_s28, 3 }
  0x22   : > { %p437_p12 = pnand %p1077_p10, %p436_p11 }
  0x23   : > { %s1415_s16 = sand.u32 (!%p437_p12), 1, %s1274_s26   ;;  %s1580_s1 = sld [smem:[#allocation8_spill]] (!%p437_p12) }
  0x24   : > { %440 = sbr.rel (%p437_p12) target bundleno = 1305 (0x519), region = 109  ;;  %s1078_s21 = sshll.u32 (!%p437_p12), %s1415_s16, 3 }
  0x25   : > { %s445_s22 = scalar_lea.vmem (!%p437_p12), [#allocation2], %s1078_s21  ;;  %s1079_s15 = sshll.u32 (!%p437_p12), %s1415_s16, 1 }
  0x26   : > { %s1581_s30 = sadd.s32 (!%p437_p12), 4294967295, %s1282_s28   ;;  %s485_s20 = scalar_lea.vmem (!%p437_p12), [#allocation3], %s1079_s15 }
  0x27   : > { %s1099_s29 = sshll.u32 (!%p437_p12), %s1581_s30, 5  ;;  %s1007_s0 = sshll.u32 (!%p437_p12), %s485_s20, 4  ;;  %s1518_s0 = int_to_ptr.vmem [resolvable:$true] %s1007_s0 }
  0x28   : > { %s994_s23 = scalar_lea.sflag (!%p437_p12), [#allocation4], %s1415_s16  ;;  %s1222_s24 = scalar_lea.vmem (!%p437_p12), %s1518_s0, 32 }
  0x29   : > { %v1215_v2 = vld [vmem:[%s1580_s1] sm:$0xff]   ;;  %vm589_vm0 = vcmask 130048   ;;  %v1284_v4 = vmov 0   ;;  %v1216_v5 = vld [vmem:[%s1580_s1 + $0x8] sm:$0xff]   ;;  %v501_v6 = vld [vmem:[%s1561_s2 + $0x30] sm:$0xff]  ;;  %vm709_vm1 = vcmask 523264   ;;  %p1223_p13 = scmp.ne.s32.totalorder %s1518_s0, %s1222_s24 }
  0x2a   : > { %1124 = vmatprep.mubr.msk.bf16.mxu0 %vm589_vm0, %v1215_v2  ;;  %v1214_v3 = vld [vmem:[%s445_s22] sm:$0xff]   ;;  %1212 = vset.pattern.permute.xlu0 %v1284_v4  ;;  %v1217_v7 = vld [vmem:[%s1580_s1 + $0x10] sm:$0xff]   ;;  %v502_v9 = vld [vmem:[%s1561_s2 + $0x38] sm:$0xff]  ;;  %v1285_v63 = vmov 0.0   ;;  %vm1286_vm2 = vmmov 0   ;;  %vm786_vm3 = vcmask 261120   ;;  %s1516_s22 = scalar_lea.hbm %s1572_s13, %s1099_s29 }
  0x2b   : > { %1213 = vset.pattern.permute.xlu1 %v1284_v4  ;;  %1122 = vmatprep.subr.bf16.mxu0 %v1214_v3  ;;  %v499_v8 = vld [vmem:[%s1561_s2 + $0x20] sm:$0xff]  ;;  %v500_v10 = vld [vmem:[%s1561_s2 + $0x28] sm:$0xff]  ;;  %v497_v11 = vld [vmem:[%s1561_s2 + $0x10] sm:$0xff]  ;;  %vm893_vm4 = vcmask 1043456   ;;  %vm889_vm5 = vcmask 64512   ;;  %vm948_vm6 = vcmask 1041408   ;;  %p1224_p0 = pnand %p1223_p13, %p1396_p6 }
  0x2c   : > { %1123 = vmatpush3.bf16.msra.mxu0 %v1214_v3  ;;  %555 = vperm.xlu0 %1212, %v501_v6   ;;  %v498_v12 = vld [vmem:[%s1561_s2 + $0x18] sm:$0xff]  ;;  %v495_v14 = vld [vmem:[%s1561_s2] sm:$0xff]  ;;  %v496_v15 = vld [vmem:[%s1561_s2 + $0x8] sm:$0xff]  ;;  %vm944_vm7 = vcmask 31744   ;;  %s1287_s15 = smov [#allocation3]  }
  0x2d   : > { %545 = vperm.xlu1 %1213, %v499_v8   ;;  %v1218_v13 = vld [vmem:[%s1580_s1 + $0x18] sm:$0xff]   ;;  %v509_v16 = vld [vmem:[%s1563_s4 + $0x10] sm:$0xff]  ;;  %v507_v18 = vld [vmem:[%s1563_s4] sm:$0xff]  ;;  %1144 = vmatprep.subr.bf16.mxu0 %v1285_v63  ;;  %p1225_p1 = pneg %p1224_p0  ;;  %s1226_s30 = sshll.u32 %s1287_s15, 4  ;;  %s1227_s30 = int_to_ptr.vmem [resolvable:$false] %s1226_s30 }
  0x2e   : > { %v510_v17 = vld [vmem:[%s1563_s4 + $0x18] sm:$0xff]  ;;  %v508_v19 = vld [vmem:[%s1563_s4 + $0x8] sm:$0xff]  ;;  %v513_v20 = vld [vmem:[%s1565_s6] sm:$0xff]  ;;  %s1228_s17 = scalar_lea.vmem %s1227_s30, 64  ;;  %p1229_p2 = scmp.lt.s32.totalorder %s1518_s0, %s1227_s30 }
  0x2f   : > { %1125 = vmatmul.mubr.msk.bf16.vlgmr.msra.gmra.mxu0 %vm589_vm0, %v1216_v5  ;;  %v514_v21 = vld [vmem:[%s1565_s6 + $0x8] sm:$0xff]  ;;  %v516_v22 = vld [vmem:[%s1567_s8] sm:$0xff]  ;;  %p1230_p3 = scmp.lt.s32.totalorder %s1228_s17, %s1222_s24 }
  0x30   : > { %1128 = vmatprep.mubr.msk.bf16.mxu0 %vm589_vm0, %v1217_v7  ;;  %560 = vperm.xlu0 %1212, %v502_v9   ;;  %v518_v23 = vld [vmem:[%s1569_s10] sm:$0xf]  ;;  %v1220_v62 = vld [vmem:[%s1562_s3 + $0x8] sm:$0xff]  }
  0x31   : > { %550 = vperm.xlu1 %1213, %v500_v10   ;;  %v520_v24 = vld [vmem:[%s1571_s12] sm:$0x3]  ;;  %p1231_p4 = por %p1230_p3, %p1229_p2 }
  0x32   : > { %v1219_v25 = vld [vmem:[%s1562_s3] sm:$0xff]  }
  0x33   : > { %1140 = vmatprep.mubr.msk.bf16.mxu1 %vm709_vm1, %v1219_v25  ;;  %p1232_p5 = pnand %p1231_p4, %p1225_p1 }
  0x34   : > { %535 = vperm.xlu0 %1212, %v497_v11  }
  0x35   : > { %540 = vperm.xlu1 %1213, %v498_v12  }
  0x37   : > { %1129 = vmatmul.mubr.msk.bf16.gmra.mxu0 %vm589_vm0, %v1218_v13 }
  0x38   : > { %525 = vperm.xlu0 %1212, %v495_v14   ;;  %1148 = vmatprep.mubr.msk.bf16.mxu0 %vm1286_vm2, %v1285_v63 }
  0x39   : > { %530 = vperm.xlu1 %1213, %v496_v15  }
  0x3c   : > { %691 = vperm.xlu0 %1212, %v509_v16  }
  0x3d   : > { %696 = vperm.xlu1 %1213, %v510_v17  }
  0x40   : > { %681 = vperm.xlu0 %1212, %v507_v18   ;;  %v1221_v18 = vld [vmem:[%s1564_s5] sm:$0xff]  }
  0x41   : > { %686 = vperm.xlu1 %1213, %v508_v19  }
  0x44   : > { %773 = vperm.xlu0 %1212, %v513_v20  }
  0x45   : > { %778 = vperm.xlu1 %1213, %v514_v21  }
  0x48   : > { %836 = vperm.xlu0 %1212, %v516_v22  }
  0x49   : > { %886 = vperm.xlu1 %1213, %v518_v23  }
  0x4c   : > { %941 = vperm.xlu0 %1212, %v520_v24  }
  0xa7   : > { %v556_v28 = vpop.permute.xlu0 %555 }
  0xa8   : > { %v546_v26 = vpop.permute.xlu1 %545 }
  0xab   : > { %v561_v33 = vpop.permute.xlu0 %560 }
  0xac   : > { %v551_v31 = vpop.permute.xlu1 %550 }
  0xaf   : > { %v536_v41 = vpop.permute.xlu0 %535 }
  0xb0   : > { %v541_v37 = vpop.permute.xlu1 %540 }
  0xb3   : > { %v526_v55 = vpop.permute.xlu0 %525 }
  0xb4   : > { %v531_v51 = vpop.permute.xlu1 %530 }
  0xb7   : > { %v692_v0 = vpop.permute.xlu0 %691 }
  0xb8   : > { %v697_v1 = vpop.permute.xlu1 %696 }
  0xbb   : > { %v682_v6 = vpop.permute.xlu0 %681 }
  0xbc   : > { %v687_v8 = vpop.permute.xlu1 %686 }
  0xbf   : > { %v774_v20 = vpop.permute.xlu0 %773 }
  0xc0   : > { %v779_v23 = vpop.permute.xlu1 %778 }
  0xef   : > { %v1126_v27 = vpop.f32.mrf.mxu0 }
  0xf0   : > { %v645_v47 = vadd.f32 %v1126_v27, %v536_v41  ;;  %v887_v41 = vpop.permute.xlu1 %886 }
  0xf1   : > { %v636_v29 = vpop.f32.mrf.mxu0 }
  0xf2   : > { %v669_v56 = vmax.f32 %v645_v47, 0.0  ;;  %v637_v57 = vadd.f32 %v636_v29, %v526_v55 }
  0xf3   : > { %v1127_v30 = vpop.f32.mrf.mxu0 }
  0xf4   : > { %v648_v43 = vadd.f32 %v1127_v30, %v541_v37  ;;  %v667_v60 = vmax.f32 %v637_v57, 0.0  ;;  %v515_v30 = vld [vmem:[%s1566_s7] sm:$0xf] }
  0xf5   : > { %v639_v32 = vpop.f32.mrf.mxu0 }
  0xf6   : > { %v670_v52 = vmax.f32 %v648_v43, 0.0  ;;  %v640_v53 = vadd.f32 %v639_v32, %v531_v51 }
  0xf7   : > { %v1130_v34 = vpop.f32.mrf.mxu0 }
  0xf8   : > { %v661_v36 = vadd.f32 %v1130_v34, %v556_v28  ;;  %v676_v58 = vpack.c.bf16 %v670_v52, %v669_v56  ;;  %v668_v59 = vmax.f32 %v640_v53, 0.0 }
  0xf9   : > { %v652_v35 = vpop.f32.mrf.mxu0 }
  0xfa   : > { %v653_v39 = vadd.f32 %v652_v35, %v546_v26  ;;  %v673_v44 = vmax.f32 %v661_v36, 0.0  ;;  %v675_v61 = vpack.c.bf16 %v668_v59, %v667_v60 }
  0xfb   : > { %v1131_v38 = vpop.f32.mrf.mxu0 }
  0xfc   : > { %v664_v40 = vadd.f32 %v1131_v38, %v561_v33  ;;  %v671_v48 = vmax.f32 %v653_v39, 0.0 }
  0xfd   : > { %v655_v42 = vpop.f32.mrf.mxu0 }
  0xfe   : > { %v674_v45 = vmax.f32 %v664_v40, 0.0  ;;  %v656_v46 = vadd.f32 %v655_v42, %v551_v31  ;;  %v837_v31 = vpop.permute.xlu0 %836  ;;  %v517_v40 = vld [vmem:[%s1568_s9] sm:$0x3] }
 0x100   : > { %v672_v49 = vmax.f32 %v656_v46, 0.0  ;;  %v678_v50 = vpack.c.bf16 %v674_v45, %v673_v44 }
 0x102   : > { %v677_v54 = vpack.c.bf16 %v672_v49, %v671_v48  ;;  %1132 = vmatprep.subr.bf16.mxu1 %v678_v50  ;;  %v942_v51 = vpop.permute.xlu0 %941 }
 0x103   : > { %1133 = vmatpush3.bf16.msra.mxu1 %v678_v50  ;;  %v519_v50 = vld [vmem:[%s1570_s11] sm:$0x1] }
 0x104   : > { %1134 = vmatprep.subr.bf16.mxu1 %v677_v54 }
 0x107   : > { %1135 = vmatpush3.bf16.msra.mxu1 %v677_v54 }
 0x108   : > { %1136 = vmatprep.subr.bf16.mxu1 %v676_v58 }
 0x10b   : > { %1137 = vmatpush3.bf16.msra.mxu1 %v676_v58 }
 0x10c   : > { %1138 = vmatprep.subr.bf16.mxu1 %v675_v61 }
 0x10f   : > { %1139 = vmatpush3.bf16.msra.mxu1 %v675_v61 }
 0x110   : > { %1152 = vmatprep.subr.bf16.mxu1 %v1285_v63 }
 0x112   : > { %1141 = vmatmul.mubr.msk.bf16.vlgmr.msra.gmra.mxu1 %vm709_vm1, %v1220_v62 }
 0x113   : > { %1154 = vmatprep.mubr.msk.bf16.mxu1 %vm1286_vm2, %v1285_v63 }
 0x1d2   : > { %v1142_v2 = vpop.f32.mrf.mxu1 }
 0x1d3   : > { %v759_v4 = vadd.f32 %v1142_v2, %v692_v0 }
 0x1d4   : > { %v750_v3 = vpop.f32.mrf.mxu1 }
 0x1d5   : > { %v767_v10 = vmax.f32 %v759_v4, 0.0  ;;  %v751_v11 = vadd.f32 %v750_v3, %v682_v6 }
 0x1d6   : > { %v1143_v5 = vpop.f32.mrf.mxu1 }
 0x1d7   : > { %v762_v7 = vadd.f32 %v1143_v5, %v697_v1  ;;  %v765_v16 = vmax.f32 %v751_v11, 0.0 }
 0x1d8   : > { %v753_v9 = vpop.f32.mrf.mxu1 }
 0x1d9   : > { %v768_v12 = vmax.f32 %v762_v7, 0.0  ;;  %v754_v13 = vadd.f32 %v753_v9, %v687_v8 }
 0x1db   : > { %v770_v14 = vpack.c.bf16 %v768_v12, %v767_v10  ;;  %v766_v15 = vmax.f32 %v754_v13, 0.0 }
 0x1dd   : > { %1145 = vmatpush3.bf16.msra.mxu0 %v770_v14  ;;  %v769_v17 = vpack.c.bf16 %v766_v15, %v765_v16 }
 0x1de   : > { %1146 = vmatprep.subr.bf16.mxu0 %v1285_v63 }
 0x1e1   : > { %1147 = vmatpush3.bf16.msra.mxu0 %v769_v17 }
 0x1e2   : > { %1158 = vmatprep.subr.bf16.mxu0 %v1285_v63 }
 0x1e4   : > { %1149 = vmatmul.mubr.msk.bf16.vlgmr.msra.gmra.mxu0 %vm786_vm3, %v1221_v18 }
 0x1e5   : > { %1160 = vmatprep.mubr.msk.bf16.mxu0 %vm1286_vm2, %v1285_v63 }
 0x2a4   : > { %v824_v19 = vpop.f32.mrf.mxu0 }
 0x2a5   : > { %v825_v22 = vadd.f32 %v824_v19, %v774_v20 }
 0x2a6   : > { %v1150_v21 = vpop.f32.mrf.mxu0 }
 0x2a7   : > { %v831_v27 = vmax.f32 %v825_v22, 0.0 }
 0x2a8   : > { %v827_v24 = vpop.f32.mrf.mxu0 }
 0x2a9   : > { %v828_v25 = vadd.f32 %v827_v24, %v779_v23 }
 0x2aa   : > { %v1151_v26 = vpop.f32.mrf.mxu0 }
 0x2ab   : > { %v832_v28 = vmax.f32 %v828_v25, 0.0 }
 0x2ad   : > { %v833_v29 = vpack.c.bf16 %v832_v28, %v831_v27 }
 0x2af   : > { %1153 = vmatpush3.bf16.msra.mxu1 %v833_v29 }
 0x2b0   : > { %1164 = vmatprep.subr.bf16.mxu1 %v1285_v63 }
 0x2b2   : > { %1155 = vmatmul.mubr.msk.bf16.vlgmr.msra.gmra.mxu1 %vm589_vm0, %v515_v30 }
 0x2b3   : > { %1166 = vmatprep.mubr.msk.bf16.mxu1 %vm1286_vm2, %v1285_v63 }
 0x372   : > { %v876_v32 = vpop.f32.mrf.mxu1 }
 0x373   : > { %v877_v33 = vadd.f32 %v876_v32, %v837_v31 }
 0x374   : > { %v1156_v34 = vpop.f32.mrf.mxu1 }
 0x375   : > { %v882_v35 = vmax.f32 %v877_v33, 0.0 }
 0x376   : > { %v879_v36 = vpop.f32.mrf.mxu1 }
 0x377   : > { %v883_v37 = vpack.c.bf16 %v882_v35, %v882_v35 }
 0x378   : > { %v1157_v38 = vpop.f32.mrf.mxu1 }
 0x379   : > { %v895_v39 = vsel %vm893_vm4, %v883_v37, 0 }
 0x37a   : > { %1159 = vmatpush3.bf16.msra.mxu0 %v895_v39 }
 0x37d   : > { %1161 = vmatmul.mubr.msk.bf16.vlgmr.msra.gmra.mxu0 %vm889_vm5, %v517_v40 }
 0x43d   : > { %v931_v42 = vpop.f32.mrf.mxu0 }
 0x43e   : > { %v932_v43 = vadd.f32 %v931_v42, %v887_v41 }
 0x43f   : > { %v1162_v44 = vpop.f32.mrf.mxu0 }
 0x440   : > { %v937_v45 = vmax.f32 %v932_v43, 0.0 }
 0x441   : > { %v934_v46 = vpop.f32.mrf.mxu0 }
 0x442   : > { %v938_v47 = vpack.c.bf16 %v937_v45, %v937_v45 }
 0x443   : > { %v1163_v48 = vpop.f32.mrf.mxu0 }
 0x444   : > { %v950_v49 = vsel %vm948_vm6, %v938_v47, 0 }
 0x445   : > { %1165 = vmatpush3.bf16.msra.mxu1 %v950_v49 }
 0x448   : > { %1167 = vmatmul.mubr.msk.bf16.vlgmr.msra.gmra.mxu1 %vm944_vm7, %v519_v50 }
 0x508   : > { %v986_v52 = vpop.f32.mrf.mxu1 }
 0x509   : > { %v987_v53 = vadd.f32 %v986_v52, %v942_v51 }
 0x50a   : > { %v1168_v54 = vpop.f32.mrf.mxu1 }
 0x50b   : > { %992 = vst [vmem:[%s485_s20] sm:$0x3] %v987_v53 }
 0x50c   : > { %v989_v55 = vpop.f32.mrf.mxu1 }
 0x50d   : > { %1235 = shalt.err (!%p1232_p5)
}
 0x50e   : > { %s1236_s29 = scalar_lea.hbm %s1516_s22, 32  ;;  %s1240_s21 = scalar_lea.hbm %s1572_s13, 64 }
 0x50f   : > { %p1237_p7 = scmp.ne.s32.totalorder %s1516_s22, %s1236_s29  ;;  %p1241_p12 = scmp.lt.s32.totalorder %s1516_s22, %s1572_s13 }
 0x510   : > { %p1242_p13 = scmp.lt.s32.totalorder %s1240_s21, %s1236_s29 }
 0x511   : > { %p1238_p10 = pnand %p1237_p7, %p1396_p6 }
 0x512   : > { %p1243_p0 = por %p1242_p13, %p1241_p12 }
 0x513   : > { %p1239_p11 = pneg %p1238_p10 }
 0x515   : > { %p1244_p1 = pnand %p1243_p0, %p1239_p11 }
 0x517   : > { %1247 = shalt.err (!%p1244_p1)
}
 0x518   : > { %1170 = dma.vmem_to_hbm [thread:$0]  (%p1396_p6), %s1518_s0, 32, %s1516_s22, %s994_s23   ;;  %v1169_v56 = vpop.f32.mrf.mxu1 }
 0x519 PF: > { %s1019_s24 = sand.u32 1, %s1270_s25   ;;  %p1173_p2 = pnand %p1074_p9, %p1400_p8 }
 0x51a   : > { %s1020_s1 = scalar_lea.sflag [#allocation4], %s1019_s24 }
 0x51b   : > { %p1174_p3 = pneg %p1173_p2 }
 0x51d   : > { %1265 = dma.done.wait (%p1174_p3), %s1020_s1, 32  }
 0x51e   : > { %1267 = vsyncadd (%p1174_p3), %s1020_s1, 4294967264  ;;  %s1582_s18 = sld [smem:[#allocation6_spill]]  ;;  %p23_p4 = scmp.ge.s32.totalorder %s1381_s14, 4  }
 0x51f   : > { %s1583_s25 = smov %s1274_s26  ;;  %s1584_s26 = smov %s1278_s27 }
 0x520   : > { %s1586_s28 = smov %s1381_s14  ;;  %25 = sbr.rel (!%p23_p4) target bundleno = 6 (0x6), region = 153 }
 0x524   : > { %s1585_s27 = smov %s1582_s18 }
 0x525   :  { %1025 = vsyncpa [#allocation4], 1 }
 0x526   :  { %1027 = vsyncpa [#allocation4 + $0x1], 1 }

</bundles_post_ra>
